<compile_context>
chip_gen: v7x
topology: tpu7x:2x2x1
jax: 0.10.0
libtpu: 0.0.40
codegen_flags: <defaults>
</compile_context>

<pallas_src>
import jax
import jax.numpy as jnp
import numpy as np
from jax.experimental import pallas as pl
from jax.experimental.pallas import tpu as pltpu


def make_pe_2d(dim, h_max, w_max, dtype=jnp.float32):
    """Replicates the torch buffer init of PositionalEncoding2D exactly."""
    assert dim % 4 == 0, "dim must be divisible by 4 (as the torch init implies)"
    pe = np.zeros((dim, h_max, w_max), dtype=np.float32)
    div = np.exp(-np.arange(0.0, dim // 2, 2) / dim * np.log(10000.0))[:, None]
    w_pos = np.arange(0.0, w_max)[None, :] * div          # (dim//4, w_max)
    h_pos = np.arange(0.0, h_max)[None, :] * div          # (dim//4, h_max)
    pe[0:dim // 2:2] = np.sin(h_pos)[:, :, None]          # broadcast over w
    pe[1:dim // 2:2] = np.cos(h_pos)[:, :, None]
    pe[dim // 2::2] = np.sin(w_pos)[:, None, :]           # broadcast over h
    pe[dim // 2 + 1::2] = np.cos(w_pos)[:, None, :]
    return jnp.asarray(pe, dtype=dtype)


def _add_pe_kernel(x_ref, pe_ref, o_ref):
    # Blocks: x (ct, st) in the input dtype, pe/o (ct, st) in the promoted
    # output dtype.  Pure VPU add; cast happens in-register.
    o_ref[...] = x_ref[...].astype(o_ref.dtype) + pe_ref[...]


def _sublane_align(*dtypes):
    """Sublane alignment for the second-minor axis: 8 (f32), 16 (bf16), 32 (i8)."""
    return max(max(8, 32 // jnp.dtype(d).itemsize) for d in dtypes)


def _choose_block(n, target, align):
    """Block size for an axis of extent n (grid dim = pl.cdiv(n, block)).

    Prefers the largest aligned divisor of n that is <= target.  If none
    exists, returns the aligned cap itself (ragged last block) so the VMEM
    footprint is always bounded by `target` — never falls back to the full
    axis extent.
    """
    if n <= target:
        return n                       # full extent is always a legal block
    cap = (target // align) * align
    c = cap
    while c >= align:
        if n % c == 0:
            return c
        c -= align
    return cap                         # ragged: last block is padded/masked


@jax.jit
def _pe_add_forward(x, pe_flat):
    """out = x + pe_flat.reshape(C, H, W), x: (B, C, H, W), pe_flat: (C, H*W)."""
    B, C, H, W = x.shape
    S = H * W
    out_dtype = pe_flat.dtype          # already the promoted dtype
    x_flat = x.reshape(B, C, S)        # contiguous reshape = layout plumbing

    # ~4 MiB f32 blocks, (8,128)-aligned (dtype-aware on the sublane axis).
    ct = _choose_block(C, 256, _sublane_align(x.dtype, out_dtype))
    st = _choose_block(S, 4096, 128)
    grid = (pl.cdiv(C, ct), pl.cdiv(S, st), B)   # batch innermost -> PE DMA reuse

    out = pl.pallas_call(
        _add_pe_kernel,
        out_shape=jax.ShapeDtypeStruct((B, C, S), out_dtype),
        grid_spec=pltpu.PrefetchScalarGridSpec(
            num_scalar_prefetch=0,
            grid=grid,
            in_specs=[
                pl.BlockSpec((pl.Squeezed(), ct, st),
                             lambda ci, si, b: (b, ci, si)),
                # PE block index is constant across the innermost b axis, so
                # its HBM->VMEM copy is elided for b > 0.
                pl.BlockSpec((ct, st), lambda ci, si, b: (ci, si)),
            ],
            out_specs=pl.BlockSpec((pl.Squeezed(), ct, st),
                                   lambda ci, si, b: (b, ci, si)),
        ),
        compiler_params=pltpu.CompilerParams(
            dimension_semantics=("parallel", "parallel", "arbitrary"),
            vmem_limit_bytes=48 * 1024 * 1024,
        ),
    )(x_flat, pe_flat)

    return out.reshape(B, C, H, W)


class PositionalEncoding2D:
    """JAX/Pallas equivalent of the torch module (buffer built once in __init__)."""

    def __init__(self, dim, h_max, w_max, dtype=jnp.float32):
        self.dim = dim
        self.h_max = h_max
        self.w_max = w_max
        self.pe = make_pe_2d(dim, h_max, w_max, dtype)   # "register_buffer"
        self._pe_flat_cache = {}                         # per (H, W, dtype) slice

    def get_pe_by_size(self, h, w, out_dtype):
        key = (h, w, jnp.dtype(out_dtype).name)
        hit = self._pe_flat_cache.get(key)
        if hit is None:
            # Hoisted out of the jitted hot path; computed once per shape.
            hit = jnp.asarray(self.pe[:, :h, :w].reshape(self.dim, h * w),
                              dtype=out_dtype)
            self._pe_flat_cache[key] = hit
        return hit

    def __call__(self, x):
        B, C, H, W = x.shape
        assert C == self.dim and H <= self.h_max and W <= self.w_max
        # Match torch type promotion (f32 buffer + bf16 input -> f32 output).
        out_dtype = jnp.result_type(x.dtype, self.pe.dtype)
        pe_flat = self.get_pe_by_size(H, W, out_dtype)
        return _pe_add_forward(x, pe_flat)


def _reference_pe_elementwise(dim, h_max, w_max):
    """Independent per-element replica of the torch buffer, for verification."""
    pe = np.zeros((dim, h_max, w_max), dtype=np.float32)
    n_half = len(np.arange(0.0, dim // 2, 2))
    for k in range(n_half):
        d = np.exp(-(2.0 * k) / dim * np.log(10000.0))
        for h in range(h_max):
            pe[2 * k, h, :] = np.sin(h * d)
            pe[2 * k + 1, h, :] = np.cos(h * d)
        for w in range(w_max):
            pe[dim // 2 + 2 * k, :, w] = np.sin(w * d)
            pe[dim // 2 + 2 * k + 1, :, w] = np.cos(w * d)
    return pe


if __name__ == "__main__":
    # Main small-shape test: x (B, C, H, W) added to a larger PE buffer.
    B, dim, H, W = 2, 32, 16, 16
    h_max, w_max = 24, 24
    enc = PositionalEncoding2D(dim, h_max, w_max)

    x = jax.random.normal(jax.random.PRNGKey(0), (B, dim, H, W), dtype=jnp.float32)
    out = jax.block_until_ready(enc(x))

    pe_ref = _reference_pe_elementwise(dim, h_max, w_max)
    np.testing.assert_allclose(np.asarray(enc.pe), pe_ref, rtol=1e-6, atol=1e-6)
    np.testing.assert_allclose(np.asarray(out),
                               np.asarray(x) + pe_ref[:, :H, :W],
                               rtol=1e-6, atol=1e-6)

    # Different (H, W) within the same buffer -> exercises the cached slice path.
    x2 = jax.random.normal(jax.random.PRNGKey(1), (B, dim, 24, 20), dtype=jnp.float32)
    out2 = jax.block_until_ready(enc(x2))
    np.testing.assert_allclose(np.asarray(out2),
                               np.asarray(x2) + pe_ref[:, :24, :20],
                               rtol=1e-6, atol=1e-6)

    # Ragged-tile path: S = 65*65 = 4225 > 4096 with no 128-aligned divisor,
    # so the hardened _choose_block caps st at 4096 and the grid goes ragged.
    enc2 = PositionalEncoding2D(16, 65, 65)
    x3 = jax.random.normal(jax.random.PRNGKey(2), (1, 16, 65, 65), dtype=jnp.float32)
    out3 = jax.block_until_ready(enc2(x3))
    pe_ref2 = _reference_pe_elementwise(16, 65, 65)
    np.testing.assert_allclose(np.asarray(out3),
                               np.asarray(x3) + pe_ref2,
                               rtol=1e-6, atol=1e-6)

    print("KERNEL_OK")
</pallas_src>

<mosaic_0001>
module attributes {stable_mosaic.version = 11 : i64} {
  func.func @_add_pe_kernel(%arg0: i32, %arg1: i32, %arg2: i32, %arg3: memref<1x32x256xf32, #tpu.memory_space<vmem>>, %arg4: memref<32x256xf32, #tpu.memory_space<vmem>>, %arg5: memref<1x32x256xf32, #tpu.memory_space<vmem>>) attributes {dimension_semantics = [#tpu.dimension_semantics<parallel>, #tpu.dimension_semantics<parallel>, #tpu.dimension_semantics<arbitrary>], iteration_bounds = array<i64: 1, 1, 2>, scalar_prefetch = 0 : i64, scratch_operands = 0 : i64, tpu.core_type = #tpu.core_type<tc>, window_params = [{transform_indices = @transform_0, window_bounds = array<i64: 1, 32, 256>}, {transform_indices = @transform_1, window_bounds = array<i64: 32, 256>}, {transform_indices = @transform_2, window_bounds = array<i64: 1, 32, 256>}]} {
    %c0 = arith.constant 0 : index
    %c0_0 = arith.constant 0 : index
    %c0_1 = arith.constant 0 : index
    %0 = vector.load %arg3[%c0, %c0_0, %c0_1] : memref<1x32x256xf32, #tpu.memory_space<vmem>>, vector<1x32x256xf32>
    %1 = vector.shape_cast %0 : vector<1x32x256xf32> to vector<32x256xf32>
    %c0_2 = arith.constant 0 : index
    %c0_3 = arith.constant 0 : index
    %2 = vector.load %arg4[%c0_2, %c0_3] : memref<32x256xf32, #tpu.memory_space<vmem>>, vector<32x256xf32>
    %3 = arith.addf %1, %2 : vector<32x256xf32>
    %c0_4 = arith.constant 0 : index
    %c0_5 = arith.constant 0 : index
    %c0_6 = arith.constant 0 : index
    %4 = vector.load %arg5[%c0_4, %c0_5, %c0_6] : memref<1x32x256xf32, #tpu.memory_space<vmem>>, vector<1x32x256xf32>
    %5 = vector.shape_cast %4 : vector<1x32x256xf32> to vector<32x256xf32>
    %6 = vector.shape_cast %3 : vector<32x256xf32> to vector<1x32x256xf32>
    tpu.vector_store %arg5[%c0_4, %c0_5, %c0_6], %6 {strides = array<i32>} : memref<1x32x256xf32, #tpu.memory_space<vmem>>, vector<1x32x256xf32>,
    return
  }
  func.func @transform_0(%arg0: i32, %arg1: i32, %arg2: i32) -> (i32, i32, i32) {
    %c0_i32 = arith.constant 0 : i32
    return %arg2, %arg0, %arg1 : i32, i32, i32
  }
  func.func @transform_1(%arg0: i32, %arg1: i32, %arg2: i32) -> (i32, i32) {
    %c0_i32 = arith.constant 0 : i32
    return %arg0, %arg1 : i32, i32
  }
  func.func @transform_2(%arg0: i32, %arg1: i32, %arg2: i32) -> (i32, i32, i32) {
    %c0_i32 = arith.constant 0 : i32
    return %arg2, %arg0, %arg1 : i32, i32, i32
  }
}

</mosaic_0001>

<bundles_post_ra>
// kernel: _pe_add_forward.1
= control target key start
LH: loop header
LB: loop body
LE: loop exit
PB: predicated region body
PF: predicated region fallthrough
CT: control target
= control target key end

     0   :  { %s508_s9 = smov 0   ;;  %s510_s10 = smov 0   ;;  %s565_s0 = inlined_call_operand.vmem [shape: f32[2,32,256], index: 0, kind: input, shape index: {}]   ;;  %s566_s1 = inlined_call_operand.vmem [shape: f32[32,256], index: 1, kind: input, shape index: {}]   ;;  %s567_s2 = inlined_call_operand.vmem [shape: f32[2,32,256], index: 2, kind: output, shape index: {}]  }
   0x1   :  { %s512_s11 = smov 0  }
   0x2 LB: > { %s24_s12 = sadd.s32 1, %s487_s10  ;;  %p436_p0 = scmp.ge.s32.totalorder %s491_s11, 1  ;;  %s491_s11 = sphi %s512_s11, %s12_s11   ;;  %s487_s10 = sphi %s510_s10, %s569_s10   ;;  %s483_s9 = sphi %s508_s9, %s568_s9  }
   0x3   : > { %p25_p1 = scmp.ge.s32.totalorder %s24_s12, 2  ;;  %p169_p2 = scmp.lt.s32.totalorder %s491_s11, 3 }
   0x5   : > { %s571_s12 = smov (%p25_p1, %s24_s12), 0  ;;  %p170_p3 = pnand %p436_p0, %p169_p2 }
   0x6   : > { %p221_p4 = scmp.lt.s32.totalorder (!%p170_p3), %s483_s9, 1  ;;  %v271_v0 = vld [vmem:[%s566_s1] sm:$0xff] (!%p170_p3)  ;;  %v272_v1 = vld [vmem:[%s566_s1 + $0x8] sm:$0xff] (!%p170_p3)  ;;  %v273_v2 = vld [vmem:[%s566_s1 + $0x10] sm:$0xff] (!%p170_p3) }
   0x7   : > { %173 = sbr.rel (%p170_p3) target bundleno = 24 (0x18), region = 28  ;;  %v274_v3 = vld [vmem:[%s566_s1 + $0x18] sm:$0xff] (!%p170_p3)  ;;  %v275_v4 = vld [vmem:[%s566_s1 + $0x20] sm:$0xff] (!%p170_p3)  ;;  %v276_v5 = vld [vmem:[%s566_s1 + $0x28] sm:$0xff] (!%p170_p3) }
   0x8   : > { %v277_v6 = vld [vmem:[%s566_s1 + $0x30] sm:$0xff] (!%p170_p3)  ;;  %v278_v7 = vld [vmem:[%s566_s1 + $0x38] sm:$0xff] (!%p170_p3) }
   0xe   : > { %s573_s9 = smov (!%p221_p4, %s483_s9), 1 }
   0xf   : > { %s443_s17 = sshll.u32 %s573_s9, 6 }
  0x10   : > { %s232_s26 = scalar_lea.vmem %s565_s0, %s443_s17  ;;  %s260_s7 = scalar_lea.vmem %s567_s2, %s443_s17 }
  0x11   : > { %v263_v8 = vld [vmem:[%s232_s26] sm:$0xff]  ;;  %v264_v9 = vld [vmem:[%s232_s26 + $0x8] sm:$0xff]  ;;  %v265_v10 = vld [vmem:[%s232_s26 + $0x10] sm:$0xff] }
  0x12   : > { %v279_v11 = vadd.f32 %v271_v0, %v263_v8  ;;  %v280_v12 = vadd.f32 %v272_v1, %v264_v9  ;;  %v281_v13 = vadd.f32 %v273_v2, %v265_v10  ;;  %v266_v14 = vld [vmem:[%s232_s26 + $0x18] sm:$0xff]  ;;  %v267_v15 = vld [vmem:[%s232_s26 + $0x20] sm:$0xff]  ;;  %v268_v16 = vld [vmem:[%s232_s26 + $0x28] sm:$0xff] }
  0x13   : > { %v282_v17 = vadd.f32 %v274_v3, %v266_v14  ;;  %v283_v18 = vadd.f32 %v275_v4, %v267_v15  ;;  %v284_v19 = vadd.f32 %v276_v5, %v268_v16  ;;  %v269_v20 = vld [vmem:[%s232_s26 + $0x30] sm:$0xff]  ;;  %v270_v21 = vld [vmem:[%s232_s26 + $0x38] sm:$0xff] }
  0x14   : > { %287 = vst [vmem:[%s260_s7] sm:$0xff] %v279_v11  ;;  %288 = vst [vmem:[%s260_s7 + $0x8] sm:$0xff] %v280_v12  ;;  %v285_v22 = vadd.f32 %v277_v6, %v269_v20  ;;  %v286_v23 = vadd.f32 %v278_v7, %v270_v21 }
  0x15   : > { %289 = vst [vmem:[%s260_s7 + $0x10] sm:$0xff] %v281_v13  ;;  %290 = vst [vmem:[%s260_s7 + $0x18] sm:$0xff] %v282_v17 }
  0x16   : > { %291 = vst [vmem:[%s260_s7 + $0x20] sm:$0xff] %v283_v18  ;;  %292 = vst [vmem:[%s260_s7 + $0x28] sm:$0xff] %v284_v19 }
  0x17   : > { %293 = vst [vmem:[%s260_s7 + $0x30] sm:$0xff] %v285_v22  ;;  %294 = vst [vmem:[%s260_s7 + $0x38] sm:$0xff] %v286_v23 }
  0x18 PF: > { %s12_s11 = sadd.s32 1, %s491_s11   ;;  %s568_s9 = smov %s487_s10 }
  0x19   : > { %p9_p5 = scmp.ge.s32.totalorder %s12_s11, 4   ;;  %s569_s10 = smov %s571_s12 }
  0x1b   :  { %11 = sbr.rel (!%p9_p5) target bundleno = 2 (0x2), region = 61 }

</bundles_post_ra>
